<compile_context>
chip_gen: v7x
topology: tpu7x:2x2x1
jax: 0.10.0
libtpu: 0.0.40
codegen_flags: <defaults>
</compile_context>

<pallas_src>
import jax
import jax.numpy as jnp
from jax.experimental import pallas as pl
from jax.experimental.pallas import tpu as pltpu


def _disc_kernel(gl_ref, glt_ref, w_ref, o_ref):
    # gl_ref : (bt, N, H)  node latents for this batch tile
    # glt_ref: (bt, N, H)  "true" node latents for this batch tile
    # w_ref  : (H, H)      bilinear weight (replicated across grid steps)
    # o_ref  : (bt, N)     per-node discriminator score
    gl = gl_ref[...].astype(jnp.float32)
    glt = glt_ref[...].astype(jnp.float32)
    w = w_ref[...].astype(jnp.float32)

    # graph summary vector: sigmoid(mean over the node axis)        -> (bt, H)
    s = jax.nn.sigmoid(jnp.mean(glt, axis=1))

    # u[b, i] = sum_k W[i, k] * s[b, k]  == (W @ true_z_b)^T        -> (bt, H)
    # Done on the (otherwise idle) MXU as s @ W^T; no (bt, H, H)
    # broadcast intermediate is ever materialized.
    u = jax.lax.dot_general(
        s, w,
        dimension_numbers=(((1,), (1,)), ((), ())),
        preferred_element_type=jnp.float32,
    )

    # logits[b, n] = sum_j gl[b, n, j] * u[b, j]                     -> (bt, N)
    # N*H work: broadcast-multiply + lane reduce on the VPU/XLU.
    logits = jnp.sum(gl * u[:, None, :], axis=-1)

    o_ref[...] = jax.nn.sigmoid(logits).astype(o_ref.dtype)


def _vmem_capacity_bytes():
    """Per-TensorCore VMEM capacity; conservative fallback if query fails."""
    try:
        return int(pltpu.get_tpu_info().vmem_capacity_bytes)
    except Exception:
        return 64 << 20  # v7x per-TC (smallest of v5e/v6e/v7x)


def _select_b_tile(B, N, H, itemsize, b_tile=None):
    """Pick the batch tile from a VMEM budget; prefer >=2 grid steps on big B."""
    if b_tile is not None:
        if B % b_tile != 0 or (b_tile != B and b_tile % 8 != 0):
            raise ValueError(
                f"b_tile={b_tile} must divide B={B} and (unless equal to B) "
                "be a multiple of 8")
        return b_tile

    budget = _vmem_capacity_bytes() // 3          # headroom: weight/out/scratch
    per_row = 2 * 2 * N * H * itemsize            # gl + glt, double-buffered
    cap = max(1, budget // per_row)

    # multiple-of-8 divisors of B that fit the budget
    divs = [d for d in range(8, min(B, cap) + 1, 8) if B % d == 0]

    if B >= 16 and divs:
        # prefer >= 2 grid steps so v7x's two TensorCores both get work
        half = [d for d in divs if d <= B // 2]
        return max(half) if half else max(divs)
    if B <= cap:
        # small batch: one fused step (per-step overhead ~0.35us dominates)
        return B
    if divs:
        return max(divs)
    # over-budget even per-row; see N-tiling TODO at the top of the file
    return B


def discriminator_forward(graph_latent, graph_latent_true, weight, *, b_tile=None):
    """sigmoid(graph_latent @ (W @ sigmoid(mean(graph_latent_true, 1))[..., None])).squeeze()"""
    B, N, H = graph_latent.shape
    assert graph_latent_true.shape == (B, N, H)
    assert weight.shape == (H, H)

    in_itemsize = jnp.dtype(graph_latent.dtype).itemsize
    bt = _select_b_tile(B, N, H, in_itemsize, b_tile)
    grid = (B // bt,)

    # Per-step VMEM footprint estimate (double-buffered inputs/outputs + W).
    need = (2 * 2 * bt * N * H * in_itemsize
            + 2 * bt * N * in_itemsize
            + 2 * H * H * jnp.dtype(weight.dtype).itemsize
            + (1 << 20))                                  # compiler scratch slack
    vmem_cap = _vmem_capacity_bytes()
    # Only raise the scoped limit when we exceed the smallest default (16 MiB
    # on v5e); cap at physical capacity so the request stays valid on v7x.
    vmem_limit = int(min(need * 1.25, vmem_cap)) if need > (16 << 20) else None

    out = pl.pallas_call(
        _disc_kernel,
        out_shape=jax.ShapeDtypeStruct((B, N), graph_latent.dtype),
        grid_spec=pltpu.PrefetchScalarGridSpec(
            num_scalar_prefetch=0,
            grid=grid,
            in_specs=[
                pl.BlockSpec((bt, N, H), lambda b: (b, 0, 0)),  # graph_latent
                pl.BlockSpec((bt, N, H), lambda b: (b, 0, 0)),  # graph_latent_true
                pl.BlockSpec((H, H), lambda b: (0, 0)),         # weight (replicated)
            ],
            out_specs=pl.BlockSpec((bt, N), lambda b: (b, 0)),
        ),
        compiler_params=pltpu.CompilerParams(
            dimension_semantics=("parallel",),
            vmem_limit_bytes=vmem_limit,
        ),
    )(graph_latent, graph_latent_true, weight)

    # torch's .squeeze() drops all singleton dims (e.g. B == 1 -> (N,))
    return jnp.squeeze(out)


if __name__ == "__main__":
    B, N, H = 2, 8, 32  # batch of graphs, nodes per graph, size_hidden

    key = jax.random.PRNGKey(0)
    k_w, k_gl, k_glt = jax.random.split(key, 3)

    # torch_geometric-style uniform init: U(-1/sqrt(size_hidden), 1/sqrt(size_hidden))
    bound = 1.0 / (H ** 0.5)
    weight = jax.random.uniform(k_w, (H, H), jnp.float32, minval=-bound, maxval=bound)

    graph_latent = jax.random.normal(k_gl, (B, N, H), dtype=jnp.float32)
    graph_latent_true = jax.random.normal(k_glt, (B, N, H), dtype=jnp.float32)

    out = discriminator_forward(graph_latent, graph_latent_true, weight)
    out = jax.block_until_ready(out)

    # pure-JAX reference of the exact PyTorch semantics
    true_z = jax.nn.sigmoid(jnp.mean(graph_latent_true, axis=1))[..., None]   # (B, H, 1)
    ref = jnp.squeeze(
        jax.nn.sigmoid(jnp.matmul(graph_latent, jnp.matmul(weight, true_z))))
    assert out.shape == (B, N)
    assert jnp.allclose(out, ref, atol=1e-5, rtol=1e-5)

    print("KERNEL_OK")
</pallas_src>

<mosaic_0001>
module attributes {stable_mosaic.version = 11 : i64} {
  func.func @_disc_kernel(%arg0: i32, %arg1: memref<2x8x32xf32, #tpu.memory_space<vmem>>, %arg2: memref<2x8x32xf32, #tpu.memory_space<vmem>>, %arg3: memref<32x32xf32, #tpu.memory_space<vmem>>, %arg4: memref<2x8xf32, #tpu.memory_space<vmem>>) attributes {dimension_semantics = [#tpu.dimension_semantics<parallel>], iteration_bounds = array<i64: 1>, scalar_prefetch = 0 : i64, scratch_operands = 0 : i64, tpu.core_type = #tpu.core_type<tc>, window_params = [{transform_indices = @transform_0, window_bounds = array<i64: 2, 8, 32>}, {transform_indices = @transform_1, window_bounds = array<i64: 2, 8, 32>}, {pipeline_mode = #tpu.pipeline_mode<synchronous>, transform_indices = @transform_2, window_bounds = array<i64: 32, 32>}, {transform_indices = @transform_3, window_bounds = array<i64: 2, 8>}]} {
    %c0 = arith.constant 0 : index
    %c0_0 = arith.constant 0 : index
    %c0_1 = arith.constant 0 : index
    %0 = vector.load %arg1[%c0, %c0_0, %c0_1] : memref<2x8x32xf32, #tpu.memory_space<vmem>>, vector<2x8x32xf32>
    %c0_2 = arith.constant 0 : index
    %c0_3 = arith.constant 0 : index
    %c0_4 = arith.constant 0 : index
    %1 = vector.load %arg2[%c0_2, %c0_3, %c0_4] : memref<2x8x32xf32, #tpu.memory_space<vmem>>, vector<2x8x32xf32>
    %c0_5 = arith.constant 0 : index
    %c0_6 = arith.constant 0 : index
    %2 = vector.load %arg3[%c0_5, %c0_6] : memref<32x32xf32, #tpu.memory_space<vmem>>, vector<32x32xf32>
    %cst = arith.constant dense<0.000000e+00> : vector<2x32xf32>
    %3 = vector.multi_reduction <add>, %1, %cst [1] : vector<2x8x32xf32> to vector<2x32xf32>
    %cst_7 = arith.constant 8.000000e+00 : f32
    %4 = vector.broadcast %cst_7 : f32 to vector<2x32xf32>
    %5 = arith.divf %3, %4 : vector<2x32xf32>
    %6 = arith.negf %5 : vector<2x32xf32>
    %7 = math.exp %6 : vector<2x32xf32>
    %cst_8 = arith.constant 1.000000e+00 : f32
    %8 = vector.broadcast %cst_8 : f32 to vector<2x32xf32>
    %9 = arith.addf %8, %7 : vector<2x32xf32>
    %10 = arith.divf %8, %9 : vector<2x32xf32>
    %cst_9 = arith.constant dense<0.000000e+00> : vector<2x32xf32>
    %11 = tpu.matmul %10, %2, %cst_9 {dimension_numbers = #tpu.dot_dimension_numbers<[1], [1], [0], [0], [0, 0, 1, 0], [], []>} : vector<2x32xf32>, vector<32x32xf32>, vector<2x32xf32> -> vector<2x32xf32>
    %12 = vector.shape_cast %11 : vector<2x32xf32> to vector<2x1x32xf32>
    %13 = vector.broadcast %12 : vector<2x1x32xf32> to vector<2x8x32xf32>
    %14 = arith.mulf %0, %13 : vector<2x8x32xf32>
    %cst_10 = arith.constant dense<0.000000e+00> : vector<2x8xf32>
    %15 = vector.multi_reduction <add>, %14, %cst_10 [2] : vector<2x8x32xf32> to vector<2x8xf32>
    %16 = arith.negf %15 : vector<2x8xf32>
    %17 = math.exp %16 : vector<2x8xf32>
    %cst_11 = arith.constant 1.000000e+00 : f32
    %18 = vector.broadcast %cst_11 : f32 to vector<2x8xf32>
    %19 = arith.addf %18, %17 : vector<2x8xf32>
    %20 = arith.divf %18, %19 : vector<2x8xf32>
    %c0_12 = arith.constant 0 : index
    %c0_13 = arith.constant 0 : index
    %21 = vector.load %arg4[%c0_12, %c0_13] : memref<2x8xf32, #tpu.memory_space<vmem>>, vector<2x8xf32>
    tpu.vector_store %arg4[%c0_12, %c0_13], %20 {strides = array<i32>} : memref<2x8xf32, #tpu.memory_space<vmem>>, vector<2x8xf32>,
    return
  }
  func.func @transform_0(%arg0: i32) -> (i32, i32, i32) {
    %c0_i32 = arith.constant 0 : i32
    %c0_i32_0 = arith.constant 0 : i32
    %c0_i32_1 = arith.constant 0 : i32
    return %arg0, %c0_i32, %c0_i32_0 : i32, i32, i32
  }
  func.func @transform_1(%arg0: i32) -> (i32, i32, i32) {
    %c0_i32 = arith.constant 0 : i32
    %c0_i32_0 = arith.constant 0 : i32
    %c0_i32_1 = arith.constant 0 : i32
    return %arg0, %c0_i32, %c0_i32_0 : i32, i32, i32
  }
  func.func @transform_2(%arg0: i32) -> (i32, i32) {
    %c0_i32 = arith.constant 0 : i32
    %c0_i32_0 = arith.constant 0 : i32
    %c0_i32_1 = arith.constant 0 : i32
    return %c0_i32, %c0_i32_0 : i32, i32
  }
  func.func @transform_3(%arg0: i32) -> (i32, i32) {
    %c0_i32 = arith.constant 0 : i32
    %c0_i32_0 = arith.constant 0 : i32
    return %arg0, %c0_i32 : i32, i32
  }
}

</mosaic_0001>

<bundles_post_ra>
// kernel: tpu_custom_call.1
= control target key start
LH: loop header
LB: loop body
LE: loop exit
PB: predicated region body
PF: predicated region fallthrough
CT: control target
= control target key end

     0   :  { %8 = vsyncpa [#allocation3], 0  ;;  %s531_s0 = inlined_call_operand.hbm [shape: f32[2,8,32], index: 0, kind: input, shape index: {}]   ;;  %s532_s1 = inlined_call_operand.hbm [shape: f32[2,8,32], index: 1, kind: input, shape index: {}]   ;;  %s533_s2 = inlined_call_operand.hbm [shape: f32[32,32], index: 2, kind: input, shape index: {}]   ;;  %s534_s3 = inlined_call_operand.hbm [shape: f32[2,8], index: 3, kind: output, shape index: {}]  }
   0x1   :  { %9 = vsyncpa [#allocation6], 0 }
   0x2   :  { %10 = vsyncpa [#allocation4], 0  ;;  %s420_s12 = smov [#allocation5]   ;;  %s421_s14 = smov [#allocation2]  }
   0x3   :  { %s28_s13 = sshll.u32 %s420_s12, 4  ;;  %s16_s15 = sshll.u32 %s421_s14, 4  ;;  %s29_s13 = int_to_ptr.vmem [resolvable:$true] %s28_s13  ;;  %s450_s15 = int_to_ptr.vmem [resolvable:$true] %s16_s15 }
   0x4   :  { %s326_s18 = scalar_lea.hbm %s532_s1, 256 }
   0x5   :  { %p327_p0 = scmp.ne.s32.totalorder %s532_s1, %s326_s18  ;;  %p330_p1 = scmp.lt.u32.totalorder %s326_s18, %s532_s1 }
   0x7   :  { %p332_p2 = pnand %p330_p1, %p327_p0 }
   0x9   :  { %335 = shalt.err (!%p332_p2)
}
   0xa   :  { %s336_s23 = scalar_lea.vmem %s29_s13, 256  ;;  %p341_p4 = scmp.lt.s32.totalorder %s29_s13, %s29_s13 }
   0xb   :  { %p337_p3 = scmp.ne.s32.totalorder %s29_s13, %s336_s23  ;;  %p342_p5 = scmp.lt.s32.totalorder %s336_s23, %s336_s23 }
   0xd   :  { %p343_p6 = por %p342_p5, %p341_p4 }
   0xf   :  { %p344_p7 = pnand %p343_p6, %p337_p3 }
  0x11   :  { %347 = shalt.err (!%p344_p7)
}
  0x12   :  { %s422_s24 = smov 128   ;;  %s423_s25 = smov 8  }
  0x13   :  { %34 = dma.hbm_to_vmem [thread:$0]  %s532_s1, 256, %s29_s13, [#allocation6], %s422_s24, %s422_s24, %s423_s25  }
  0x14   :  { %s348_s30 = scalar_lea.hbm %s531_s0, 256 }
  0x15   :  { %p349_p8 = scmp.ne.s32.totalorder %s531_s0, %s348_s30  ;;  %p352_p9 = scmp.lt.u32.totalorder %s348_s30, %s531_s0 }
  0x17   :  { %p354_p10 = pnand %p352_p9, %p349_p8 }
  0x19   :  { %357 = shalt.err (!%p354_p10)
}
  0x1a   :  { %s358_s8 = scalar_lea.vmem %s450_s15, 256  ;;  %p363_p12 = scmp.lt.s32.totalorder %s450_s15, %s450_s15 }
  0x1b   :  { %p359_p11 = scmp.ne.s32.totalorder %s450_s15, %s358_s8  ;;  %p364_p13 = scmp.lt.s32.totalorder %s358_s8, %s358_s8 }
  0x1d   :  { %p365_p0 = por %p364_p13, %p363_p12 }
  0x1f   :  { %p366_p1 = pnand %p365_p0, %p359_p11 }
  0x21   :  { %369 = shalt.err (!%p366_p1)
}
  0x22   :  { %22 = dma.hbm_to_vmem [thread:$0]  %s531_s0, 256, %s450_s15, [#allocation3], %s422_s24, %s422_s24, %s423_s25  }
  0x23   :  { %s424_s10 = smov [#allocation7]   ;;  %s370_s14 = scalar_lea.hbm %s533_s2, 512 }
  0x24   :  { %s40_s11 = sshll.u32 %s424_s10, 4  ;;  %p371_p2 = scmp.ne.s32.totalorder %s533_s2, %s370_s14  ;;  %s41_s11 = int_to_ptr.vmem [resolvable:$true] %s40_s11 }
  0x25   :  { %p374_p3 = scmp.lt.u32.totalorder %s370_s14, %s533_s2 }
  0x27   :  { %p376_p4 = pnand %p374_p3, %p371_p2 }
  0x29   :  { %379 = shalt.err (!%p376_p4)
}
  0x2a   :  { %s380_s20 = scalar_lea.vmem %s41_s11, 512  ;;  %p385_p6 = scmp.lt.s32.totalorder %s41_s11, %s41_s11 }
  0x2b   :  { %p381_p5 = scmp.ne.s32.totalorder %s41_s11, %s380_s20  ;;  %p386_p7 = scmp.lt.s32.totalorder %s380_s20, %s380_s20 }
  0x2d   :  { %p387_p8 = por %p386_p7, %p385_p6 }
  0x2f   :  { %p388_p9 = pnand %p387_p8, %p381_p5 }
  0x31   :  { %391 = shalt.err (!%p388_p9)
}
  0x32   :  { %46 = dma.hbm_to_vmem [thread:$0]  %s533_s2, 512, %s41_s11, [#allocation6], %s422_s24, %s422_s24, %s423_s25  }
  0x33   :  { %414 = dma.done.wait [#allocation3], 256  }
  0x34   :  { %415 = vsyncadd [#allocation3], 4294967040 }
  0x35   :  { %416 = dma.done.wait [#allocation6], 768  }
  0x36   :  { %417 = vsyncadd [#allocation6], 4294966528  ;;  %v425_v0 = vmov 0.0|0.0   ;;  %vm426_vm0 = vmmov 0   ;;  %v427_v1 = vmov 0.0   ;;  %vm64_vm1 = vcmask 261120  }
  0x37   :  { %292 = vmatprep.subr.bf16.mxu0 %v425_v0  ;;  %289 = vmatprep.mubr.msk.f32.mxu0 %vm426_vm0, %v427_v1  ;;  %v58_v2 = vld [vmem:[#allocation5] sm:$0xff]  ;;  %v59_v3 = vld [vmem:[#allocation5 + $0x8] sm:$0xff]  ;;  %v60_v4 = vld [vmem:[#allocation7] sm:$0xff]  ;;  %vm96_vm3 = vcmask 1041409   ;;  %v428_v36 = vmov 1966171168   ;;  %v186_v38 = vlaneseq }
  0x38   :  { %v61_v5 = vld [vmem:[#allocation7 + $0x8] sm:$0xff]  ;;  %v65_v6 = vsel %vm64_vm1, %v58_v2, 0.0  ;;  %v72_v7 = vsel %vm64_vm1, %v59_v3, 0.0  ;;  %vm506_vm2 = vmpackc.low %vm64_vm1, %vm64_vm1  ;;  %v62_v14 = vld [vmem:[#allocation7 + $0x10] sm:$0xff]  ;;  %v184_v37 = vunpack.c.l.s4 %v428_v36  ;;  %s429_s2 = smov [#allocation8]   ;;  %vm249_vm4 = vcmask 58368  }
  0x39   :  { %v66_v9 = vrot.slane %v65_v6, 4  ;;  %v73_v10 = vrot.slane %v72_v7, 4  ;;  %v293_v11 = vpack.c.bf16 %v61_v5, %v60_v4  ;;  %v63_v15 = vld [vmem:[#allocation7 + $0x18] sm:$0xff]  ;;  %v187_v40 = vshrl.u32 %v186_v38, 7  ;;  %v56_v48 = vld [vmem:[#allocation2] sm:$0xff]  ;;  %v57_v51 = vld [vmem:[#allocation2 + $0x8] sm:$0xff] }
  0x3a   :  { %v297_v20 = vpack.c.bf16 %v63_v15, %v62_v14  ;;  %v185_v39 = vunpack.c.0.s8 %v184_v37  ;;  %v238_v1 = vand.u32 127, %v186_v38  ;;  %s257_s21 = sshll.u32 %s429_s2, 4  ;;  %s258_s21 = int_to_ptr.vmem [resolvable:$true] %s257_s21 }
  0x3b   :  { %v67_v12 = vadd.f32 %v66_v9, %v65_v6  ;;  %v74_v13 = vadd.f32 %v73_v10, %v72_v7  ;;  %295 = vmatpush3.bf16.xpose.msk.msra.mxu0 %vm506_vm2, %v293_v11  ;;  %v207_v45 = vsub.s32 0, %v187_v40  ;;  %s392_s22 = scalar_lea.vmem %s258_s21, 32  ;;  %p397_p11 = scmp.lt.s32.totalorder %s258_s21, %s258_s21 }
  0x3c   :  { %296 = vmatprep.subr.bf16.mxu0 %v425_v0  ;;  %v188_v41 = vsub.s32 %v185_v39, %v187_v40  ;;  %v241_v2 = vsub.s32 %v238_v1, %v187_v40  ;;  %p393_p10 = scmp.ne.s32.totalorder %s258_s21, %s392_s22  ;;  %p398_p12 = scmp.lt.s32.totalorder %s392_s22, %s392_s22 }
  0x3d   :  { %v68_v16 = vrot.slane %v67_v12, 2  ;;  %v75_v17 = vrot.slane %v74_v13, 2 }
  0x3e   :  { %p399_p13 = por %p398_p12, %p397_p11 }
  0x3f   :  { %v69_v18 = vadd.f32 %v68_v16, %v67_v12  ;;  %v76_v19 = vadd.f32 %v75_v17, %v74_v13 }
  0x40   :  { %p400_p0 = pnand %p399_p13, %p393_p10 }
  0x41   :  { %v70_v21 = vrot.slane %v69_v18, 1  ;;  %v77_v22 = vrot.slane %v76_v19, 1 }
  0x43   :  { %v71_v23 = vadd.f32 %v70_v21, %v69_v18  ;;  %v78_v24 = vadd.f32 %v77_v22, %v76_v19  ;;  %299 = vmatpush3.bf16.xpose.msk.msra.mxu0 %vm506_vm2, %v297_v20 }
  0x45   :  { %v267_v25 = vmul.f32 -0.125, %v71_v23  ;;  %v268_v26 = vmul.f32 -0.125, %v78_v24 }
  0x47   :  { %v84_v27 = vmul.f32 1.442695, %v267_v25  ;;  %v86_v28 = vmul.f32 1.442695, %v268_v26 }
  0x49   :  { %310 = vpow2.f32 %v84_v27 }
  0x4a   :  { %312 = vpow2.f32 %v86_v28 }
  0x53   :  { %v311_v29 = vpop.eup %310 }
  0x54   :  { %v313_v30 = vpop.eup %312  ;;  %v88_v31 = vadd.f32 1.0, %v311_v29 }
  0x55   :  { %v89_v32 = vadd.f32 1.0, %v313_v30 }
  0x56   :  { %314 = vrcp.f32 %v88_v31 }
  0x57   :  { %316 = vrcp.f32 %v89_v32 }
  0x60   :  { %v315_v33 = vpop.eup %314 }
  0x61   :  { %v317_v34 = vpop.eup %316 }
  0x62   :  { %v97_v35 = vsel %vm96_vm3, %v317_v34, %v315_v33 }
  0x63   :  { %290 = vmatmul.mubr.msk.f32.vlgmr.msra.gmra.mrb[0].mxu0 %vm64_vm1, %v97_v35 }
 0x136   :  { %v178_v42 = vpop.f32.mrb[0].mxu0 }
 0x137   :  { %v189_v43 = vrot.slane %v178_v42, %v188_v41  ;;  %v291_v44 = vpop.f32.mrb[1].mxu0 }
 0x139   :  { %v190_v46 = vcombine.high %v189_v43, %v189_v43  ;;  %v197_v47 = vrot.slane %v189_v43, %v188_v41 }
 0x13b   :  { %v204_v49 = vrot.slane %v190_v46, %v188_v41  ;;  %v208_v50 = vrot.slane %v197_v47, %v207_v45 }
 0x13d   :  { %v215_v52 = vmul.f32 %v208_v50, %v56_v48  ;;  %v212_v53 = vrot.slane %v204_v49, %v207_v45 }
 0x13f   :  { %v217_v54 = vsel %vm64_vm1, %v215_v52, 0.0  ;;  %v216_v55 = vmul.f32 %v212_v53, %v57_v51 }
 0x140   :  { %218 = vadd.xlane.f32.xlu0 %v217_v54 }
 0x141   :  { %v220_v56 = vsel %vm64_vm1, %v216_v55, 0.0 }
 0x144   :  { %221 = vadd.xlane.f32.xlu0 %v220_v56 }
 0x1cd   :  { %v219_v57 = vpop.xlane.xlu0 %218 }
 0x1ce   :  { %v274_v58 = vmul.f32 -1.442695, %v219_v57 }
 0x1d0   :  { %318 = vpow2.f32 %v274_v58 }
 0x1d1   :  { %v222_v59 = vpop.xlane.xlu0 %221 }
 0x1d2   :  { %v275_v60 = vmul.f32 -1.442695, %v222_v59 }
 0x1d4   :  { %320 = vpow2.f32 %v275_v60 }
 0x1da   :  { %v319_v61 = vpop.eup %318 }
 0x1db   :  { %v229_v62 = vadd.f32 1.0, %v319_v61 }
 0x1dd   :  { %322 = vrcp.f32 %v229_v62 }
 0x1de   :  { %v321_v63 = vpop.eup %320 }
 0x1df   :  { %v230_v0 = vadd.f32 1.0, %v321_v63 }
 0x1e1   :  { %324 = vrcp.f32 %v230_v0 }
 0x1e7   :  { %v323_v3 = vpop.eup %322 }
 0x1e8   :  { %v242_v5 = vrot.slane %v323_v3, %v241_v2 }
 0x1eb   :  { %v325_v4 = vpop.eup %324 }
 0x1ec   :  { %v246_v6 = vrot.slane %v325_v4, %v241_v2 }
 0x1ee   :  { %v247_v7 = vsel %vm96_vm3, %v246_v6, %v242_v5 }
 0x1ef   :  { %250 = vst.msk [vmem:[#allocation8] sm:$0x3] %vm249_vm4, %v247_v7 }
 0x1f0   :  { %403 = shalt.err (!%p400_p0)
}
 0x1f1   :  { %s404_s25 = scalar_lea.hbm %s534_s3, 32 }
 0x1f2   :  { %p405_p1 = scmp.ne.s32.totalorder %s534_s3, %s404_s25  ;;  %p408_p2 = scmp.lt.u32.totalorder %s404_s25, %s534_s3 }
 0x1f4   :  { %p410_p3 = pnand %p408_p2, %p405_p1 }
 0x1f6   :  { %413 = shalt.err (!%p410_p3)
}
 0x1f7   :  { %260 = dma.vmem_to_hbm [thread:$0]  %s258_s21, 32, %s534_s3, [#allocation4]  }
 0x1f8   :  { %418 = dma.done.wait [#allocation4], 32  }
 0x1f9   :  { %419 = vsyncadd [#allocation4], 4294967264 }
 0x1fa   :  { %264 = vsyncpa [#allocation3], 1 }
 0x1fb   :  { %265 = vsyncpa [#allocation6], 1 }
 0x1fc   :  { %266 = vsyncpa [#allocation4], 1 }

</bundles_post_ra>
